<compile_context>
chip_gen: v6e
topology: v6e:2x2x1
jax: 0.10.0
libtpu: 0.0.40
codegen_flags: <defaults>
</compile_context>

<pallas_src>
import math

import jax
import jax.numpy as jnp
from jax.experimental import pallas as pl
from jax.experimental.pallas import tpu as pltpu


def _round_up(n: int, m: int) -> int:
    return ((n + m - 1) // m) * m


def ffn_kernel(x_ref, w1_ref, b1_ref, w2_ref, b2_ref, o_ref, acc_ref):
    """Grid = (M tiles [parallel], H tiles [arbitrary/reduction])."""
    k = pl.program_id(1)

    @pl.when(k == 0)
    def _():
        acc_ref[...] = jnp.zeros_like(acc_ref)

    # linear1 chunk: (tm, D) @ (D, th) -> f32; bias + ReLU in f32.
    h = jnp.dot(x_ref[...], w1_ref[...], preferred_element_type=jnp.float32)
    h = jnp.maximum(h + b1_ref[...], 0.0)

    # dropout: eval-mode identity.
    # TODO(synk): training-mode dropout (p=0.1) omitted; would use pltpu.prng_*.

    # linear2 partial sum over this hidden chunk: (tm, th) @ (th, D), f32 acc.
    acc_ref[...] += jnp.dot(h.astype(w2_ref.dtype), w2_ref[...],
                            preferred_element_type=jnp.float32)

    @pl.when(k == pl.num_programs(1) - 1)
    def _():
        o_ref[...] = (acc_ref[...] + b2_ref[...]).astype(o_ref.dtype)


def feed_forward(x, w1, b1, w2, b2, *, tm=256, th=512):
    """x: (B, S, d_model); w1: (d_model, hidden); w2: (hidden, d_model)."""
    B, S, D = x.shape
    H = w1.shape[1]
    M = B * S
    out_dtype = x.dtype

    # Effective tile sizes (lane/sublane aligned, never larger than the problem).
    tm = min(tm, _round_up(M, 128))
    th = min(th, _round_up(H, 128))

    # Pad to tile-aligned shapes (zero padding is neutral for this FFN).
    Mp = _round_up(M, tm)
    Dp = _round_up(D, 128)
    Hp = _round_up(H, th)

    x2d = jnp.pad(x.reshape(M, D), ((0, Mp - M), (0, Dp - D)))
    w1p = jnp.pad(w1, ((0, Dp - D), (0, Hp - H)))
    w2p = jnp.pad(w2, ((0, Hp - H), (0, Dp - D)))
    b1p = jnp.pad(b1, (0, Hp - H)).reshape(1, Hp).astype(jnp.float32)
    b2p = jnp.pad(b2, (0, Dp - D)).reshape(1, Dp).astype(jnp.float32)

    # bf16 for the MXU operands; accumulation / bias / ReLU stay f32.
    x2d = x2d.astype(jnp.bfloat16)
    w1p = w1p.astype(jnp.bfloat16)
    w2p = w2p.astype(jnp.bfloat16)

    grid = (Mp // tm, Hp // th)

    # VMEM budget: double-buffered in/out tiles + f32 accumulator + headroom.
    out_isz = jnp.dtype(out_dtype).itemsize
    tile_bytes = (tm * Dp * 2            # x tile (bf16)
                  + Dp * th * 2          # W1 column block (bf16)
                  + 8 * th * 4           # b1 chunk (f32, sublane-padded)
                  + th * Dp * 2          # W2 row block (bf16)
                  + 8 * Dp * 4           # b2 (f32, sublane-padded)
                  + tm * Dp * out_isz)   # out tile
    vmem_limit = int(min(2 * tile_bytes + tm * Dp * 4 + (8 << 20), 64 << 20))

    cost = pl.CostEstimate(
        flops=4 * Mp * Dp * Hp,          # two matmuls: 2*M*D*H each
        transcendentals=0,
        bytes_accessed=(Mp * Dp * 2 + Dp * Hp * 2 + Hp * Dp * 2
                        + Hp * 4 + Dp * 4 + Mp * Dp * out_isz),
    )

    out2d = pl.pallas_call(
        ffn_kernel,
        out_shape=jax.ShapeDtypeStruct((Mp, Dp), out_dtype),
        grid_spec=pltpu.PrefetchScalarGridSpec(
            num_scalar_prefetch=0,
            grid=grid,
            in_specs=[
                pl.BlockSpec((tm, Dp), lambda i, k: (i, 0)),   # x tile
                pl.BlockSpec((Dp, th), lambda i, k: (0, k)),   # W1[:, k-chunk]
                pl.BlockSpec((1, th), lambda i, k: (0, k)),    # b1[k-chunk]
                pl.BlockSpec((th, Dp), lambda i, k: (k, 0)),   # W2[k-chunk, :]
                pl.BlockSpec((1, Dp), lambda i, k: (0, 0)),    # b2
            ],
            out_specs=pl.BlockSpec((tm, Dp), lambda i, k: (i, 0)),
            scratch_shapes=[pltpu.VMEM((tm, Dp), jnp.float32)],
        ),
        compiler_params=pltpu.CompilerParams(
            dimension_semantics=("parallel", "arbitrary"),
            vmem_limit_bytes=vmem_limit,
        ),
        cost_estimate=cost,
    )(x2d, w1p, b1p, w2p, b2p)

    return out2d[:M, :D].reshape(B, S, D)


def init_linear_params(key, in_features, out_features, dtype=jnp.float32):
    """Mimics nn.Linear defaults: U(-1/sqrt(in), 1/sqrt(in)).
    Weight returned pre-transposed as (in_features, out_features)."""
    kw, kb = jax.random.split(key)
    bound = 1.0 / math.sqrt(in_features)
    w = jax.random.uniform(kw, (in_features, out_features), dtype,
                           minval=-bound, maxval=bound)
    b = jax.random.uniform(kb, (out_features,), dtype,
                           minval=-bound, maxval=bound)
    return w, b


if __name__ == "__main__":
    # Small but lane-aligned shapes consistent with the module
    # (batch, seq, d_model) with an FFN hidden expansion.
    batch, seq, d_model, hidden = 2, 128, 256, 512

    key = jax.random.PRNGKey(0)
    kx, k1, k2 = jax.random.split(key, 3)

    x = jax.random.normal(kx, (batch, seq, d_model), jnp.float32)
    w1, b1 = init_linear_params(k1, d_model, hidden)
    w2, b2 = init_linear_params(k2, hidden, d_model)

    # tm=128 / th=256 -> 2x2 grid so both grid axes are exercised at test size.
    out = feed_forward(x, w1, b1, w2, b2, tm=128, th=256)
    out = jax.block_until_ready(out)

    # Pure-JAX reference using the same bf16-matmul / f32-accumulate dtype path.
    xb = x.reshape(-1, d_model).astype(jnp.bfloat16)
    h = jnp.dot(xb, w1.astype(jnp.bfloat16),
                preferred_element_type=jnp.float32) + b1
    h = jnp.maximum(h, 0.0)
    ref = jnp.dot(h.astype(jnp.bfloat16), w2.astype(jnp.bfloat16),
                  preferred_element_type=jnp.float32) + b2
    ref = ref.reshape(batch, seq, d_model)

    assert out.shape == (batch, seq, d_model)
    assert jnp.allclose(out, ref, atol=2e-2, rtol=2e-2), \
        float(jnp.max(jnp.abs(out - ref)))

    print("KERNEL_OK")
</pallas_src>

<mosaic_0001>
module attributes {stable_mosaic.version = 11 : i64} {
  func.func @ffn_kernel(%arg0: i32, %arg1: i32, %arg2: memref<128x256xbf16, #tpu.memory_space<vmem>>, %arg3: memref<256x256xbf16, #tpu.memory_space<vmem>>, %arg4: memref<1x256xf32, #tpu.memory_space<vmem>>, %arg5: memref<256x256xbf16, #tpu.memory_space<vmem>>, %arg6: memref<1x256xf32, #tpu.memory_space<vmem>>, %arg7: memref<128x256xf32, #tpu.memory_space<vmem>>, %arg8: memref<128x256xf32, #tpu.memory_space<vmem>>) attributes {dimension_semantics = [#tpu.dimension_semantics<parallel>, #tpu.dimension_semantics<arbitrary>], iteration_bounds = array<i64: 2, 2>, scalar_prefetch = 0 : i64, scratch_operands = 1 : i64, tpu.core_type = #tpu.core_type<tc>, window_params = [{transform_indices = @transform_0, window_bounds = array<i64: 128, 256>}, {transform_indices = @transform_1, window_bounds = array<i64: 256, 256>}, {transform_indices = @transform_2, window_bounds = array<i64: 1, 256>}, {transform_indices = @transform_3, window_bounds = array<i64: 256, 256>}, {pipeline_mode = #tpu.pipeline_mode<synchronous>, transform_indices = @transform_4, window_bounds = array<i64: 1, 256>}, {transform_indices = @transform_5, window_bounds = array<i64: 128, 256>}]} {
    %c0_i32 = arith.constant 0 : i32
    %0 = arith.cmpi eq, %arg1, %c0_i32 : i32
    %1 = arith.extui %0 : i1 to i32
    %c0_i32_0 = arith.constant 0 : i32
    %2 = arith.cmpi ne, %1, %c0_i32_0 : i32
    scf.if %2 {
      %cst_15 = arith.constant 0.000000e+00 : f32
      %20 = vector.broadcast %cst_15 : f32 to vector<128x256xf32>
      %c0_16 = arith.constant 0 : index
      %c0_17 = arith.constant 0 : index
      %21 = vector.load %arg8[%c0_16, %c0_17] : memref<128x256xf32, #tpu.memory_space<vmem>>, vector<128x256xf32>
      tpu.vector_store %arg8[%c0_16, %c0_17], %20 {strides = array<i32>} : memref<128x256xf32, #tpu.memory_space<vmem>>, vector<128x256xf32>,
    } else {
    }
    %c0 = arith.constant 0 : index
    %c0_1 = arith.constant 0 : index
    %3 = vector.load %arg2[%c0, %c0_1] : memref<128x256xbf16, #tpu.memory_space<vmem>>, vector<128x256xbf16>
    %c0_2 = arith.constant 0 : index
    %c0_3 = arith.constant 0 : index
    %4 = vector.load %arg3[%c0_2, %c0_3] : memref<256x256xbf16, #tpu.memory_space<vmem>>, vector<256x256xbf16>
    %cst = arith.constant dense<0.000000e+00> : vector<128x256xf32>
    %5 = tpu.matmul %3, %4, %cst {dimension_numbers = #tpu.dot_dimension_numbers<[1], [0], [0], [1], [0, 0, 1, 1], [], []>} : vector<128x256xbf16>, vector<256x256xbf16>, vector<128x256xf32> -> vector<128x256xf32>
    %c0_4 = arith.constant 0 : index
    %c0_5 = arith.constant 0 : index
    %6 = vector.load %arg4[%c0_4, %c0_5] : memref<1x256xf32, #tpu.memory_space<vmem>>, vector<1x256xf32>
    %7 = vector.broadcast %6 : vector<1x256xf32> to vector<128x256xf32>
    %8 = arith.addf %5, %7 : vector<128x256xf32>
    %cst_6 = arith.constant 0.000000e+00 : f32
    %9 = vector.broadcast %cst_6 : f32 to vector<128x256xf32>
    %10 = arith.maximumf %8, %9 : vector<128x256xf32>
    %c0_7 = arith.constant 0 : index
    %c0_8 = arith.constant 0 : index
    %11 = vector.load %arg8[%c0_7, %c0_8] : memref<128x256xf32, #tpu.memory_space<vmem>>, vector<128x256xf32>
    %12 = arith.truncf %10 : vector<128x256xf32> to vector<128x256xbf16>
    %c0_9 = arith.constant 0 : index
    %c0_10 = arith.constant 0 : index
    %13 = vector.load %arg5[%c0_9, %c0_10] : memref<256x256xbf16, #tpu.memory_space<vmem>>, vector<256x256xbf16>
    %cst_11 = arith.constant dense<0.000000e+00> : vector<128x256xf32>
    %14 = tpu.matmul %12, %13, %cst_11 {dimension_numbers = #tpu.dot_dimension_numbers<[1], [0], [0], [1], [0, 0, 1, 1], [], []>} : vector<128x256xbf16>, vector<256x256xbf16>, vector<128x256xf32> -> vector<128x256xf32>
    %15 = arith.addf %11, %14 : vector<128x256xf32>
    %c0_12 = arith.constant 0 : index
    %c0_13 = arith.constant 0 : index
    %16 = vector.load %arg8[%c0_12, %c0_13] : memref<128x256xf32, #tpu.memory_space<vmem>>, vector<128x256xf32>
    tpu.vector_store %arg8[%c0_12, %c0_13], %15 {strides = array<i32>} : memref<128x256xf32, #tpu.memory_space<vmem>>, vector<128x256xf32>,
    %c1_i32 = arith.constant 1 : i32
    %17 = arith.cmpi eq, %arg1, %c1_i32 : i32
    %18 = arith.extui %17 : i1 to i32
    %c0_i32_14 = arith.constant 0 : i32
    %19 = arith.cmpi ne, %18, %c0_i32_14 : i32
    scf.if %19 {
      %c0_15 = arith.constant 0 : index
      %c0_16 = arith.constant 0 : index
      %20 = vector.load %arg8[%c0_15, %c0_16] : memref<128x256xf32, #tpu.memory_space<vmem>>, vector<128x256xf32>
      %c0_17 = arith.constant 0 : index
      %c0_18 = arith.constant 0 : index
      %21 = vector.load %arg6[%c0_17, %c0_18] : memref<1x256xf32, #tpu.memory_space<vmem>>, vector<1x256xf32>
      %22 = vector.broadcast %21 : vector<1x256xf32> to vector<128x256xf32>
      %23 = arith.addf %20, %22 : vector<128x256xf32>
      %c0_19 = arith.constant 0 : index
      %c0_20 = arith.constant 0 : index
      %24 = vector.load %arg7[%c0_19, %c0_20] : memref<128x256xf32, #tpu.memory_space<vmem>>, vector<128x256xf32>
      tpu.vector_store %arg7[%c0_19, %c0_20], %23 {strides = array<i32>} : memref<128x256xf32, #tpu.memory_space<vmem>>, vector<128x256xf32>,
    } else {
    }
    return
  }
  func.func @transform_0(%arg0: i32, %arg1: i32) -> (i32, i32) {
    %c0_i32 = arith.constant 0 : i32
    %c0_i32_0 = arith.constant 0 : i32
    return %arg0, %c0_i32 : i32, i32
  }
  func.func @transform_1(%arg0: i32, %arg1: i32) -> (i32, i32) {
    %c0_i32 = arith.constant 0 : i32
    %c0_i32_0 = arith.constant 0 : i32
    return %c0_i32, %arg1 : i32, i32
  }
  func.func @transform_2(%arg0: i32, %arg1: i32) -> (i32, i32) {
    %c0_i32 = arith.constant 0 : i32
    %c0_i32_0 = arith.constant 0 : i32
    return %c0_i32, %arg1 : i32, i32
  }
  func.func @transform_3(%arg0: i32, %arg1: i32) -> (i32, i32) {
    %c0_i32 = arith.constant 0 : i32
    %c0_i32_0 = arith.constant 0 : i32
    return %arg1, %c0_i32 : i32, i32
  }
  func.func @transform_4(%arg0: i32, %arg1: i32) -> (i32, i32) {
    %c0_i32 = arith.constant 0 : i32
    %c0_i32_0 = arith.constant 0 : i32
    %c0_i32_1 = arith.constant 0 : i32
    return %c0_i32, %c0_i32_0 : i32, i32
  }
  func.func @transform_5(%arg0: i32, %arg1: i32) -> (i32, i32) {
    %c0_i32 = arith.constant 0 : i32
    %c0_i32_0 = arith.constant 0 : i32
    return %arg0, %c0_i32 : i32, i32
  }
}

</mosaic_0001>

<bundles_post_ra>
// kernel: tpu_custom_call.1
= control target key start
LH: loop header
LB: loop body
LE: loop exit
PB: predicated region body
PF: predicated region fallthrough
CT: control target
= control target key end

     0   :  { %s2715_s0 = inlined_call_operand.hbm [shape: bf16[256,256], index: 0, kind: input, shape index: {}]   ;;  %s2716_s1 = inlined_call_operand.hbm [shape: bf16[256,512], index: 1, kind: input, shape index: {}]   ;;  %s2717_s2 = inlined_call_operand.hbm [shape: f32[1,512], index: 2, kind: input, shape index: {}]   ;;  %s2718_s3 = inlined_call_operand.hbm [shape: bf16[512,256], index: 3, kind: input, shape index: {}]   ;;  %s2719_s4 = inlined_call_operand.vmem [shape: f32[1,256], index: 4, kind: input, shape index: {}]   ;;  %s2720_s5 = inlined_call_operand.hbm [shape: f32[256,256], index: 5, kind: output, shape index: {}]  }
   0x1   :  { %2738 = sst [smem:[#allocation27_spill]] %s2715_s0 }
   0x2   :  { %2739 = sst [smem:[#allocation28_spill]] %s2716_s1 }
   0x3   :  { %2740 = sst [smem:[#allocation29_spill]] %s2719_s4 }
   0x4   :  { %2741 = sst [smem:[#allocation30_spill]] %s2720_s5 }
   0x5   :  { %10 = vsyncpa [#allocation4], 0 }
   0x6   :  { %12 = vsyncpa [#allocation4 + $0x1], 0 }
   0x7   :  { %13 = vsyncpa [#allocation7], 0 }
   0x8   :  { %15 = vsyncpa [#allocation7 + $0x1], 0 }
   0x9   :  { %16 = vsyncpa [#allocation10], 0 }
   0xa   :  { %18 = vsyncpa [#allocation10 + $0x1], 0 }
   0xb   :  { %19 = vsyncpa [#allocation5], 0 }
   0xc   :  { %21 = vsyncpa [#allocation5 + $0x1], 0  ;;  %s2198_s18 = smov 0   ;;  %s2200_s19 = smov 0  }
   0xd   :  { %s2202_s20 = smov 0   ;;  %s2204_s21 = smov 0  }
   0xe   :  { %s2206_s22 = smov 0   ;;  %s2208_s23 = smov 0  }
   0xf   :  { %s2210_s24 = smov 0   ;;  %s2212_s25 = smov 0  }
  0x10   :  { %s2214_s26 = smov 0   ;;  %s2216_s27 = smov 0  }
  0x11   :  { %s2218_s28 = smov 0  }
  0x12 LB: > { %2742 = sst [smem:[#allocation16_spill]] %s2123_s20  ;;  %p54_p0 = scmp.eq.s32.totalorder %s2155_s28, 0  ;;  %s2155_s28 = sphi %s2218_s28, %s27_s28   ;;  %s2151_s27 = sphi %s2216_s27, %s2782_s27   ;;  %s2147_s26 = sphi %s2214_s26, %s2788_s26   ;;  %s2143_s25 = sphi %s2212_s25, %s2780_s25   ;;  %s2139_s24 = sphi %s2210_s24, %s2787_s24   ;;  %s2135_s23 = sphi %s2208_s23, %s2779_s23   ;;  %s2131_s22 = sphi %s2206_s22, %s2786_s22   ;;  %s2127_s21 = sphi %s2204_s21, %s2785_s21   ;;  %s2123_s20 = sphi %s2202_s20, %s2777_s20   ;;  %s2119_s19 = sphi %s2200_s19, %s2784_s19   ;;  %s2115_s18 = sphi %s2198_s18, %s2783_s18  }
  0x13   : > { %2743 = sst [smem:[#allocation17_spill]] %s2127_s21  ;;  %s72_s29 = sadd.s32 1, %s2123_s20 }
  0x14   : > { %2744 = sst [smem:[#allocation18_spill]] %s2135_s23  ;;  %p79_p1 = scmp.ne.s32.totalorder %s2123_s20, %s2119_s19 }
  0x15   : > { %2745 = sst [smem:[#allocation19_spill]] %s2143_s25  ;;  %p85_p2 = scmp.ne.s32.totalorder %s2119_s19, %s2115_s18 }
  0x16   : > { %2746 = sst [smem:[#allocation20_spill]] %s2151_s27  ;;  %p2728_p3 = scmp.lt.s32.totalorder %s2155_s28, 4 }
  0x17   : > { %2747 = sst [smem:[#allocation21_spill]] %s2155_s28  ;;  %p81_p4 = por %p79_p1, %p54_p0 }
  0x18   : > { %s233_s30 = sand.u32 1, %s2155_s28   ;;  %s2264_s6 = sand.u32 1, %s2123_s20  }
  0x19   : > { %s2721_s7 = sshll.u32 %s2264_s6, 8  ;;  %s1666_s8 = sshll.u32 %s2147_s26, 7 }
  0x1a   : > { %s2748_s1 = sld [smem:[#allocation28_spill]]  ;;  %s237_s12 = scalar_lea.vmem [#allocation6], %s2721_s7 }
  0x1b   : > { %s244_s13 = sshll.u32 %s237_s12, 4  ;;  %p2275_p5 = pnand %p2728_p3, %p81_p4  ;;  %s245_s13 = int_to_ptr.vmem [resolvable:$true] %s244_s13 }
  0x1c   : > { %p1570_p6 = scmp.ge.s32.totalorder %s2155_s28, 1  ;;  %s2280_s15 = scalar_lea.sflag [#allocation7], %s233_s30 }
  0x1d   : > { %p2727_p7 = pneg %p2275_p5  ;;  %s1928_s16 = scalar_lea.vmem %s245_s13, 4096 }
  0x1e   : > { %p1929_p8 = scmp.ne.s32.totalorder %s245_s13, %s1928_s16  ;;  %s2157_s17 = smov [#allocation6]  }
  0x20   : > { %s243_s11 = scalar_lea.hbm %s2748_s1, %s1666_s8  ;;  %p1931_p9 = pnand %p1929_p8, %p2727_p7 }
  0x21   : > { %s1933_s8 = sshll.u32 %s2157_s17, 4  ;;  %s1934_s8 = int_to_ptr.vmem [resolvable:$false] %s1933_s8 }
  0x22   : > { %p1932_p10 = pneg %p1931_p9  ;;  %s1935_s9 = scalar_lea.vmem %s1934_s8, 8192 }
  0x23   : > { %p1936_p11 = scmp.lt.s32.totalorder %s245_s13, %s1934_s8  ;;  %p1937_p12 = scmp.lt.s32.totalorder %s1935_s9, %s1928_s16 }
  0x25   : > { %p1938_p13 = por %p1937_p12, %p1936_p11 }
  0x27   : > { %p1939_p1 = pnand %p1938_p13, %p1932_p10 }
  0x29   : > { %1942 = shalt.err (!%p1939_p1)
}
  0x2a   : > { %s2158_s10 = smov 256   ;;  %s2722_s30 = smov 128  }
  0x2b   : > { %s2724_s12 = smov 8   ;;  %p293_p4 = scmp.lt.s32.totalorder %s2155_s28, 5 }
  0x2c   : > { %1688 = dma.hbm_to_vmem [thread:$0]  (!%p2275_p5), %s243_s11, 4096, %s245_s13, %s2280_s15, %s2158_s10, %s2722_s30, %s2724_s12  }
  0x2d   : > { %p2295_p8 = pnand %p1570_p6, %p293_p4  ;;  %s2300_s17 = sadd.s32 4294967295, %s2155_s28  }
  0x2e   : > { %s1553_s8 = sadd.s32 4294967294, %s2155_s28   ;;  %s36_s9 = sadd.s32 1, %s2147_s26 }
  0x2f   : > { %s39_s7 = sadd.s32 1, %s2151_s27  ;;  %p37_p9 = scmp.ge.s32.totalorder %s36_s9, 2 }
  0x30   : > { %s46_s11 = sadd.s32 1, %s2135_s23  ;;  %p53_p10 = scmp.ne.s32.totalorder %s2135_s23, %s2131_s22 }
  0x31   : > { %p59_p11 = scmp.ne.s32.totalorder %s2131_s22, %s2127_s21  ;;  %s2790_s9 = smov (%p37_p9, %s36_s9), 0 }
  0x32   : > { %2751 = sst [smem:[#allocation22_spill]] %s2790_s9  ;;  %s2792_s7 = smov (!%p37_p9, %s39_s7), %s2151_s27 }
  0x33   : > { %p2318_p6 = por %p54_p0, %p53_p10  ;;  %p60_p12 = scmp.eq.s32.totalorder %s2300_s17, 0 }
  0x34   : > { %p41_p13 = scmp.ge.s32.totalorder %s2792_s7, 2  ;;  %s69_s10 = ssub.s32 %s2147_s26, %s2790_s9 }
  0x35   : > { %p2328_p1 = por %p60_p12, %p59_p11  ;;  %p70_p4 = scmp.eq.s32.totalorder %s69_s10, 0 }
  0x36   : > { %s2794_s7 = smov (%p41_p13, %s2792_s7), 0  ;;  %p2344_p0 = por %p85_p2, %p60_p12 }
  0x37   : > { %2754 = sst [smem:[#allocation23_spill]] %s2794_s7  ;;  %s43_s1 = ssub.s32 %s2151_s27, %s2794_s7 }
  0x38   : > { %s2337_s12 = scalar_select %p70_p4, %s2123_s20, %s72_s29  }
  0x39   : > { %p44_p9 = scmp.eq.s32.totalorder %s43_s1, 0  ;;  %p182_p7 = scmp.eq.s32.totalorder %s2300_s17, 3 }
  0x3a   : > { %2755 = sst [smem:[#allocation24_spill]] %s2337_s12  ;;  %p188_p3 = scmp.eq.s32.totalorder %s1553_s8, 3 }
  0x3b   : > { %s211_s10 = sand.u32 1, %s2135_s23   ;;  %p2356_p13 = por %p182_p7, %p53_p10 }
  0x3c   : > { %s2351_s9 = scalar_select %p44_p9, %s2135_s23, %s46_s11  }
  0x3d   : > { %p2363_p4 = por %p188_p3, %p59_p11  ;;  %s1556_s7 = sshll.u32 %s211_s10, 7 }
  0x3e   : > { %2757 = sst [smem:[#allocation25_spill]] %s2351_s9  ;;  %s1665_s12 = sshll.u32 %s2151_s27, 11 }
  0x3f   : > { %s2759_s18 = scalar_select %p2363_p4, 1, 0 }
  0x40   : > { %s2761_s0 = sld [smem:[#allocation27_spill]]  ;;  %s215_s8 = scalar_lea.vmem [#allocation3], %s1556_s7 }
  0x41   : > { %2760 = sst [smem:[#allocation26_spill]] %s2759_s18  ;;  %s223_s4 = sshll.u32 %s215_s8, 4  ;;  %s224_s4 = int_to_ptr.vmem [resolvable:$true] %s223_s4 }
  0x42   : > { %p2762_p2 = scmp.lt.s32.totalorder %s2155_s28, 4  ;;  %s1563_s9 = sshll.u32 %s2264_s6, 1 }
  0x43   : > { %s1667_s23 = sshll.u32 %s2147_s26, 5  ;;  %s212_s21 = scalar_lea.sflag [#allocation4], %s211_s10 }
  0x44   : > { %p2375_p7 = pnand %p2762_p2, %p2318_p6  ;;  %s1956_s27 = scalar_lea.vmem %s224_s4, 2048 }
  0x45   : > { %p1957_p10 = scmp.ne.s32.totalorder %s224_s4, %s1956_s27  ;;  %s2161_s20 = smov [#allocation3]  }
  0x46   : > { %s222_s1 = scalar_lea.hbm %s2761_s0, %s1665_s12  ;;  %p1945_p3 = pneg %p2375_p7 }
  0x47   : > { %s1961_s25 = sshll.u32 %s2161_s20, 4  ;;  %s1962_s25 = int_to_ptr.vmem [resolvable:$false] %s1961_s25 }
  0x48   : > { %p1959_p11 = pnand %p1957_p10, %p1945_p3  ;;  %s1963_s7 = scalar_lea.vmem %s1962_s25, 4096 }
  0x49   : > { %p1964_p9 = scmp.lt.s32.totalorder %s224_s4, %s1962_s25  ;;  %p1965_p4 = scmp.lt.s32.totalorder %s1963_s7, %s1956_s27 }
  0x4a   : > { %p1960_p12 = pneg %p1959_p11 }
  0x4b   : > { %p1966_p6 = por %p1965_p4, %p1964_p9 }
  0x4d   : > { %p1967_p2 = pnand %p1966_p6, %p1960_p12 }
  0x4f   : > { %1970 = shalt.err (!%p1967_p2)
}
  0x50   : > { %s2764_s12 = smov 8   ;;  %s2765_s13 = smov 128  }
  0x51   : > { %1685 = dma.hbm_to_vmem [thread:$0]  (!%p2375_p7), %s222_s1, 2048, %s224_s4, %s212_s21, %s2765_s13, %s2765_s13, %s2764_s12  }
  0x52   : > { %s264_s0 = scalar_lea.hbm %s2717_s2, %s1667_s23  ;;  %s258_s18 = scalar_lea.vmem [#allocation8], %s1563_s9 }
  0x53   : > { %s266_s20 = sshll.u32 %s258_s18, 4  ;;  %p2766_p4 = pneg %p2275_p5  ;;  %s267_s20 = int_to_ptr.vmem [resolvable:$true] %s266_s20 }
  0x54   : > { %s1984_s28 = scalar_lea.vmem %s267_s20, 32  ;;  %s2162_s27 = smov [#allocation8]  }
  0x55   : > { %p1985_p3 = scmp.ne.s32.totalorder %s267_s20, %s1984_s28  ;;  %s1989_s11 = sshll.u32 %s2162_s27, 4  ;;  %s1990_s11 = int_to_ptr.vmem [resolvable:$false] %s1989_s11 }
  0x56   : > { %s1991_s25 = scalar_lea.vmem %s1990_s11, 64  ;;  %p1992_p12 = scmp.lt.s32.totalorder %s267_s20, %s1990_s11 }
  0x57   : > { %p1987_p10 = pnand %p1985_p3, %p2766_p4  ;;  %p1993_p9 = scmp.lt.s32.totalorder %s1991_s25, %s1984_s28 }
  0x59   : > { %p1988_p11 = pneg %p1987_p10  ;;  %p1994_p7 = por %p1993_p9, %p1992_p12 }
  0x5b   : > { %p1995_p6 = pnand %p1994_p7, %p1988_p11 }
  0x5d   : > { %1998 = shalt.err (!%p1995_p6)
}
  0x5e   : > { %1691 = dma.hbm_to_vmem [thread:$0]  (!%p2275_p5), %s264_s0, 32, %s267_s20, %s2280_s15  }
  0x5f   : > { %s1669_s4 = sshll.u32 %s2147_s26, 12  ;;  %s2767_s18 = sshll.u32 %s2264_s6, 8 }
  0x60   : > { %s284_s9 = scalar_lea.hbm %s2718_s3, %s1669_s4  ;;  %s277_s1 = scalar_lea.vmem [#allocation9], %s2767_s18 }
  0x61   : > { %s285_s7 = sshll.u32 %s277_s1, 4  ;;  %s274_s28 = scalar_lea.sflag [#allocation10], %s2264_s6  ;;  %s286_s7 = int_to_ptr.vmem [resolvable:$true] %s285_s7 }
  0x62   : > { %s2012_s10 = scalar_lea.vmem %s286_s7, 4096  ;;  %p2768_p3 = pmov %p2766_p4 }
  0x63   : > { %p2013_p2 = scmp.ne.s32.totalorder %s286_s7, %s2012_s10  ;;  %s2163_s8 = smov [#allocation9]  }
  0x64   : > { %s2017_s27 = sshll.u32 %s2163_s8, 4  ;;  %s2018_s27 = int_to_ptr.vmem [resolvable:$false] %s2017_s27 }
  0x65   : > { %p2015_p4 = pnand %p2013_p2, %p2768_p3  ;;  %s2019_s0 = scalar_lea.vmem %s2018_s27, 8192 }
  0x66   : > { %p2020_p11 = scmp.lt.s32.totalorder %s286_s7, %s2018_s27  ;;  %p2021_p12 = scmp.lt.s32.totalorder %s2019_s0, %s2012_s10 }
  0x67   : > { %p2016_p10 = pneg %p2015_p4 }
  0x68   : > { %p2022_p9 = por %p2021_p12, %p2020_p11 }
  0x6a   : > { %p2023_p7 = pnand %p2022_p9, %p2016_p10 }
  0x6c   : > { %2026 = shalt.err (!%p2023_p7)
}
  0x6d   : > { %1694 = dma.hbm_to_vmem [thread:$0]  (!%p2275_p5), %s284_s9, 4096, %s286_s7, %s274_s28, %s2765_s13, %s2765_s13, %s2764_s12  }
  0x6e   : > { %297 = sbr.rel (%p2295_p8) target bundleno = 722 (0x2d2), region = 40  ;;  %s2415_s6 = sand.u32 (!%p2295_p8), 1, %s2131_s22  }
  0x6f   : > { %s1571_s15 = sshll.u32 (!%p2295_p8), %s2415_s6, 7  ;;  %s300_s20 = scalar_lea.sflag (!%p2295_p8), [#allocation4], %s2415_s6 }
  0x70   : > { %s2419_s11 = scalar_lea.vmem (!%p2295_p8), [#allocation3], %s1571_s15 }
  0x73   : > { %2098 = dma.done.wait (%p2328_p1), %s300_s20, 2048  }
  0x74   : > { %2100 = vsyncadd (%p2328_p1), %s300_s20, 4294965248  ;;  %s308_s14 = sand.u32 1, %s2300_s17   ;;  %s310_s16 = sand.u32 1, %s2119_s19  }
  0x75   : > { %s1572_s12 = sshll.u32 %s310_s16, 8  ;;  %s309_s13 = scalar_lea.sflag [#allocation7], %s308_s14 }
  0x76   : > { %s2427_s25 = scalar_lea.vmem [#allocation6], %s1572_s12 }
  0x77   : > { %2102 = dma.done.wait (%p2344_p0), %s309_s13, 4128  }
  0x78   : > { %2104 = vsyncadd (%p2344_p0), %s309_s13, 4294963168  ;;  %s1573_s4 = sshll.u32 %s310_s16, 1  ;;  %s327_s30 = scalar_lea.sflag [#allocation10], %s310_s16 }
  0x79   : > { %s2433_s21 = scalar_lea.vmem [#allocation8], %s1573_s4  ;;  %s2435_s23 = scalar_lea.vmem [#allocation9], %s1572_s12 }
  0x7a   : > { %2106 = dma.done.wait (%p2344_p0), %s327_s30, 4096  }
  0x7b   : > { %2108 = vsyncadd (%p2344_p0), %s327_s30, 4294963200  ;;  %s1575_s17 = sshll.u32 %s2415_s6, 8  ;;  %p1576_p5 = scmp.ne.s32.totalorder %s2139_s24, 0 }
  0x7c   : > { %s2442_s9 = scalar_lea.vmem [#allocation11], %s1575_s17 }
  0x7d   : > { %380 = sbr.rel (%p1576_p5) target bundleno = 147 (0x93), region = 60 }
  0x82   : > { %v2164_v0 = vmov 0.0  }
  0x83   : > { %381 = vst [vmem:[#allocation2 + $0xb0] sm:$0xff] %v2164_v0  ;;  %382 = vst [vmem:[#allocation2] sm:$0xff] %v2164_v0 }
  0x84   : > { %383 = vst [vmem:[#allocation2 + $0xd8] sm:$0xff] %v2164_v0  ;;  %384 = vst [vmem:[#allocation2 + $0x18] sm:$0xff] %v2164_v0 }
  0x85   : > { %385 = vst [vmem:[#allocation2 + $0x50] sm:$0xff] %v2164_v0  ;;  %386 = vst [vmem:[#allocation2 + $0x68] sm:$0xff] %v2164_v0 }
  0x86   : > { %387 = vst [vmem:[#allocation2 + $0x30] sm:$0xff] %v2164_v0  ;;  %388 = vst [vmem:[#allocation2 + $0x48] sm:$0xff] %v2164_v0 }
  0x87   : > { %389 = vst [vmem:[#allocation2 + $0x80] sm:$0xff] %v2164_v0  ;;  %390 = vst [vmem:[#allocation2 + $0x88] sm:$0xff] %v2164_v0 }
  0x88   : > { %391 = vst [vmem:[#allocation2 + $0xe8] sm:$0xff] %v2164_v0  ;;  %392 = vst [vmem:[#allocation2 + $0xb8] sm:$0xff] %v2164_v0 }
  0x89   : > { %393 = vst [vmem:[#allocation2 + $0x60] sm:$0xff] %v2164_v0  ;;  %394 = vst [vmem:[#allocation2 + $0xf0] sm:$0xff] %v2164_v0 }
  0x8a   : > { %395 = vst [vmem:[#allocation2 + $0x8] sm:$0xff] %v2164_v0  ;;  %396 = vst [vmem:[#allocation2 + $0x78] sm:$0xff] %v2164_v0 }
  0x8b   : > { %397 = vst [vmem:[#allocation2 + $0x38] sm:$0xff] %v2164_v0  ;;  %398 = vst [vmem:[#allocation2 + $0x58] sm:$0xff] %v2164_v0 }
  0x8c   : > { %399 = vst [vmem:[#allocation2 + $0x40] sm:$0xff] %v2164_v0  ;;  %400 = vst [vmem:[#allocation2 + $0xc8] sm:$0xff] %v2164_v0 }
  0x8d   : > { %401 = vst [vmem:[#allocation2 + $0xe0] sm:$0xff] %v2164_v0  ;;  %402 = vst [vmem:[#allocation2 + $0x90] sm:$0xff] %v2164_v0 }
  0x8e   : > { %403 = vst [vmem:[#allocation2 + $0x70] sm:$0xff] %v2164_v0  ;;  %404 = vst [vmem:[#allocation2 + $0xc0] sm:$0xff] %v2164_v0 }
  0x8f   : > { %405 = vst [vmem:[#allocation2 + $0xa8] sm:$0xff] %v2164_v0  ;;  %406 = vst [vmem:[#allocation2 + $0xd0] sm:$0xff] %v2164_v0 }
  0x90   : > { %407 = vst [vmem:[#allocation2 + $0x10] sm:$0xff] %v2164_v0  ;;  %408 = vst [vmem:[#allocation2 + $0x28] sm:$0xff] %v2164_v0 }
  0x91   : > { %409 = vst [vmem:[#allocation2 + $0xa0] sm:$0xff] %v2164_v0  ;;  %410 = vst [vmem:[#allocation2 + $0xf8] sm:$0xff] %v2164_v0 }
  0x92   : > { %411 = vst [vmem:[#allocation2 + $0x20] sm:$0xff] %v2164_v0  ;;  %412 = vst [vmem:[#allocation2 + $0x98] sm:$0xff] %v2164_v0 }
  0x93 PF: > { %v1795_v1 = vld [vmem:[%s2427_s25 + $0x74] ss:$8 sps:$4 sm:$0xff]   ;;  %v1797_v2 = vld [vmem:[%s2427_s25 + $0x70] ss:$8 sps:$4 sm:$0xff]   ;;  %v1798_v3 = vld [vmem:[%s2427_s25 + $0x64] ss:$8 sps:$4 sm:$0xff]  }
  0x94   : > { %713 = vmatprep.subr.bf16.mxu0 %v1795_v1  ;;  %v1800_v4 = vld [vmem:[%s2427_s25 + $0x60] ss:$8 sps:$4 sm:$0xff]   ;;  %v1801_v5 = vld [vmem:[%s2427_s25 + $0x54] ss:$8 sps:$4 sm:$0xff]   ;;  %v1803_v6 = vld [vmem:[%s2427_s25 + $0x50] ss:$8 sps:$4 sm:$0xff]  }
  0x95   : > { %714 = vmatpush1.bf16.msra.mxu0 %v1797_v2  ;;  %v1804_v7 = vld [vmem:[%s2427_s25 + $0x44] ss:$8 sps:$4 sm:$0xff]   ;;  %v1806_v8 = vld [vmem:[%s2427_s25 + $0x40] ss:$8 sps:$4 sm:$0xff]   ;;  %v1807_v9 = vld [vmem:[%s2427_s25 + $0x34] ss:$8 sps:$4 sm:$0xff]  }
  0x96   : > { %715 = vmatprep.subr.bf16.mxu0 %v1798_v3  ;;  %v1809_v10 = vld [vmem:[%s2427_s25 + $0x30] ss:$8 sps:$4 sm:$0xff]   ;;  %v1810_v11 = vld [vmem:[%s2427_s25 + $0x24] ss:$8 sps:$4 sm:$0xff]   ;;  %v1812_v12 = vld [vmem:[%s2427_s25 + $0x20] ss:$8 sps:$4 sm:$0xff]  }
  0x97   : > { %v1813_v13 = vld [vmem:[%s2427_s25 + $0x14] ss:$8 sps:$4 sm:$0xff]   ;;  %v1845_v14 = vld [vmem:[%s2419_s11 + $0x4] ss:$8 sps:$4 sm:$0xff]   ;;  %v1815_v15 = vld [vmem:[%s2427_s25 + $0x10] ss:$8 sps:$4 sm:$0xff]  }
  0x98   : > { %v1816_v16 = vld [vmem:[%s2427_s25 + $0x4] ss:$8 sps:$4 sm:$0xff]   ;;  %745 = vmatprep.mubr.bf16.mxu0 %v1845_v14  ;;  %v1818_v17 = vld [vmem:[%s2427_s25] ss:$8 sps:$4 sm:$0xff]   ;;  %v1819_v18 = vld [vmem:[%s2427_s25 + $0xf4] ss:$8 sps:$4 sm:$0xff]  }
  0x99   : > { %716 = vmatpush1.bf16.msra.mxu0 %v1800_v4  ;;  %v1821_v19 = vld [vmem:[%s2427_s25 + $0xf0] ss:$8 sps:$4 sm:$0xff]   ;;  %v1822_v20 = vld [vmem:[%s2427_s25 + $0xe4] ss:$8 sps:$4 sm:$0xff]   ;;  %v1869_v22 = vld [vmem:[%s2435_s23 + $0x70] ss:$8 sps:$4 sm:$0xff]  }
  0x9a   : > { %717 = vmatprep.subr.bf16.mxu0 %v1801_v5  ;;  %v1867_v21 = vld [vmem:[%s2435_s23 + $0x74] ss:$8 sps:$4 sm:$0xff]   ;;  %v1870_v24 = vld [vmem:[%s2435_s23 + $0x64] ss:$8 sps:$4 sm:$0xff]   ;;  %v1825_v25 = vld [vmem:[%s2427_s25 + $0xd4] ss:$8 sps:$4 sm:$0xff]  }
  0x9b   : > { %v1824_v23 = vld [vmem:[%s2427_s25 + $0xe0] ss:$8 sps:$4 sm:$0xff]   ;;  %1098 = vmatprep.subr.bf16.mxu1 %v1867_v21  ;;  %v1872_v26 = vld [vmem:[%s2435_s23 + $0x60] ss:$8 sps:$4 sm:$0xff]   ;;  %v1827_v28 = vld [vmem:[%s2427_s25 + $0xd0] ss:$8 sps:$4 sm:$0xff]  }
  0x9c   : > { %1099 = vmatpush1.bf16.msra.mxu1 %v1869_v22  ;;  %v1873_v27 = vld [vmem:[%s2435_s23 + $0x54] ss:$8 sps:$4 sm:$0xff]   ;;  %v1828_v29 = vld [vmem:[%s2427_s25 + $0xc4] ss:$8 sps:$4 sm:$0xff]   ;;  %v1875_v30 = vld [vmem:[%s2435_s23 + $0x50] ss:$8 sps:$4 sm:$0xff]  }
  0x9d   : > { %718 = vmatpush1.bf16.msra.mxu0 %v1803_v6  ;;  %1100 = vmatprep.subr.bf16.mxu1 %v1870_v24  ;;  %v1876_v31 = vld [vmem:[%s2435_s23 + $0x44] ss:$8 sps:$4 sm:$0xff]   ;;  %v1831_v33 = vld [vmem:[%s2427_s25 + $0xb4] ss:$8 sps:$4 sm:$0xff]   ;;  %v1878_v34 = vld [vmem:[%s2435_s23 + $0x40] ss:$8 sps:$4 sm:$0xff]  }
  0x9e   : > { %719 = vmatprep.subr.bf16.mxu0 %v1804_v7  ;;  %v1830_v32 = vld [vmem:[%s2427_s25 + $0xc0] ss:$8 sps:$4 sm:$0xff]   ;;  %v1833_v36 = vld [vmem:[%s2427_s25 + $0xb0] ss:$8 sps:$4 sm:$0xff]   ;;  %v1834_v37 = vld [vmem:[%s2427_s25 + $0xa4] ss:$8 sps:$4 sm:$0xff]  }
  0x9f   : > { %v1879_v35 = vld [vmem:[%s2435_s23 + $0x34] ss:$8 sps:$4 sm:$0xff]   ;;  %v1881_v38 = vld [vmem:[%s2435_s23 + $0x30] ss:$8 sps:$4 sm:$0xff]   ;;  %v1882_v39 = vld [vmem:[%s2435_s23 + $0x24] ss:$8 sps:$4 sm:$0xff]  }
  0xa0   : > { %1101 = vmatpush1.bf16.msra.mxu1 %v1872_v26  ;;  %v1836_v40 = vld [vmem:[%s2427_s25 + $0xa0] ss:$8 sps:$4 sm:$0xff]   ;;  %v1884_v41 = vld [vmem:[%s2435_s23 + $0x20] ss:$8 sps:$4 sm:$0xff]   ;;  %v1837_v42 = vld [vmem:[%s2427_s25 + $0x94] ss:$8 sps:$4 sm:$0xff]  }
  0xa1   : > { %720 = vmatpush1.bf16.msra.mxu0 %v1806_v8  ;;  %1102 = vmatprep.subr.bf16.mxu1 %v1873_v27  ;;  %v1885_v43 = vld [vmem:[%s2435_s23 + $0x14] ss:$8 sps:$4 sm:$0xff]   ;;  %v1887_v45 = vld [vmem:[%s2435_s23 + $0x10] ss:$8 sps:$4 sm:$0xff]   ;;  %v1840_v46 = vld [vmem:[%s2427_s25 + $0x84] ss:$8 sps:$4 sm:$0xff]  }
  0xa2   : > { %721 = vmatprep.subr.bf16.mxu0 %v1807_v9  ;;  %v1839_v44 = vld [vmem:[%s2427_s25 + $0x90] ss:$8 sps:$4 sm:$0xff]   ;;  %v1842_v48 = vld [vmem:[%s2427_s25 + $0x80] ss:$8 sps:$4 sm:$0xff]   ;;  %v1890_v49 = vld [vmem:[%s2435_s23] ss:$8 sps:$4 sm:$0xff]  }
  0xa3   : > { %v1888_v47 = vld [vmem:[%s2435_s23 + $0x4] ss:$8 sps:$4 sm:$0xff]   ;;  %v1891_v50 = vld [vmem:[%s2435_s23 + $0xf4] ss:$8 sps:$4 sm:$0xff]   ;;  %v1846_v52 = vld [vmem:[%s2419_s11 + $0x14] ss:$8 sps:$4 sm:$0xff]  }
  0xa4   : > { %1103 = vmatpush1.bf16.msra.mxu1 %v1875_v30  ;;  %v1843_v51 = vld [vmem:[%s2419_s11] ss:$8 sps:$4 sm:$0xff]   ;;  %v1893_v53 = vld [vmem:[%s2435_s23 + $0xf0] ss:$8 sps:$4 sm:$0xff]   ;;  %v1896_v55 = vld [vmem:[%s2435_s23 + $0xe0] ss:$8 sps:$4 sm:$0xff]  }
  0xa5   : > { %722 = vmatpush1.bf16.msra.mxu0 %v1809_v10  ;;  %1104 = vmatprep.subr.bf16.mxu1 %v1876_v31  ;;  %v1894_v54 = vld [vmem:[%s2435_s23 + $0xe4] ss:$8 sps:$4 sm:$0xff]   ;;  %v1897_v56 = vld [vmem:[%s2435_s23 + $0xd4] ss:$8 sps:$4 sm:$0xff]   ;;  %v1849_v58 = vld [vmem:[%s2419_s11 + $0x24] ss:$8 sps:$4 sm:$0xff]  }
  0xa6   : > { %723 = vmatprep.subr.bf16.mxu0 %v1810_v11  ;;  %v1848_v57 = vld [vmem:[%s2419_s11 + $0x10] ss:$8 sps:$4 sm:$0xff]   ;;  %v1899_v59 = vld [vmem:[%s2435_s23 + $0xd0] ss:$8 sps:$4 sm:$0xff]   ;;  %v1902_v61 = vld [vmem:[%s2435_s23 + $0xc0] ss:$8 sps:$4 sm:$0xff]  }
  0xa7   : > { %v1900_v60 = vld [vmem:[%s2435_s23 + $0xc4] ss:$8 sps:$4 sm:$0xff]   ;;  %v1903_v62 = vld [vmem:[%s2435_s23 + $0xb4] ss:$8 sps:$4 sm:$0xff]   ;;  %v1852_v0 = vld [vmem:[%s2419_s11 + $0x34] ss:$8 sps:$4 sm:$0xff]  }
  0xa8   : > { %1105 = vmatpush1.bf16.msra.mxu1 %v1878_v34  ;;  %v1851_v63 = vld [vmem:[%s2419_s11 + $0x20] ss:$8 sps:$4 sm:$0xff]   ;;  %v1905_v1 = vld [vmem:[%s2435_s23 + $0xb0] ss:$8 sps:$4 sm:$0xff]   ;;  %v1854_v2 = vld [vmem:[%s2419_s11 + $0x30] ss:$8 sps:$4 sm:$0xff]  }
  0xa9   : > { %724 = vmatpush1.bf16.msra.mxu0 %v1812_v12  ;;  %1106 = vmatprep.subr.bf16.mxu1 %v1879_v35  ;;  %v1855_v3 = vld [vmem:[%s2419_s11 + $0x44] ss:$8 sps:$4 sm:$0xff]   ;;  %v1857_v4 = vld [vmem:[%s2419_s11 + $0x40] ss:$8 sps:$4 sm:$0xff]   ;;  %v1858_v5 = vld [vmem:[%s2419_s11 + $0x54] ss:$8 sps:$4 sm:$0xff]  }
  0xaa   : > { %725 = vmatprep.subr.bf16.mxu0 %v1813_v13  ;;  %v1860_v6 = vld [vmem:[%s2419_s11 + $0x50] ss:$8 sps:$4 sm:$0xff]   ;;  %v1861_v7 = vld [vmem:[%s2419_s11 + $0x64] ss:$8 sps:$4 sm:$0xff]   ;;  %v1863_v8 = vld [vmem:[%s2419_s11 + $0x60] ss:$8 sps:$4 sm:$0xff]  }
  0xab   : > { %v1864_v9 = vld [vmem:[%s2419_s11 + $0x74] ss:$8 sps:$4 sm:$0xff]   ;;  %v1866_v10 = vld [vmem:[%s2419_s11 + $0x70] ss:$8 sps:$4 sm:$0xff]   ;;  %v1908_v12 = vld [vmem:[%s2435_s23 + $0xa0] ss:$8 sps:$4 sm:$0xff]  }
  0xac   : > { %1107 = vmatpush1.bf16.msra.mxu1 %v1881_v38  ;;  %v1906_v11 = vld [vmem:[%s2435_s23 + $0xa4] ss:$8 sps:$4 sm:$0xff]   ;;  %v1909_v13 = vld [vmem:[%s2435_s23 + $0x94] ss:$8 sps:$4 sm:$0xff]   ;;  %v1911_v14 = vld [vmem:[%s2435_s23 + $0x90] ss:$8 sps:$4 sm:$0xff]  }
  0xad   : > { %726 = vmatpush1.bf16.msra.mxu0 %v1815_v15  ;;  %1108 = vmatprep.subr.bf16.mxu1 %v1882_v39  ;;  %v1912_v15 = vld [vmem:[%s2435_s23 + $0x84] ss:$8 sps:$4 sm:$0xff]   ;;  %v461_v21 = vld [vmem:[%s2433_s21] sm:$0x3]  ;;  %p1657_p8 = scmp.ne.s32.totalorder %s2139_s24, 1 }
  0xae   : > { %727 = vmatprep.subr.bf16.mxu0 %v1816_v16  ;;  %v1914_v16 = vld [vmem:[%s2435_s23 + $0x80] ss:$8 sps:$4 sm:$0xff]   ;;  %s2769_s1 = sld [smem:[#allocation29_spill]] (!%p1657_p8) }
  0xb0   : > { %1109 = vmatpush1.bf16.msra.mxu1 %v1884_v41 }
  0xb1   : > { %728 = vmatpush1.bf16.msra.mxu0 %v1818_v17  ;;  %1110 = vmatprep.subr.bf16.mxu1 %v1885_v43  ;;  %v463_v17 = vlaneseq }
  0xb2   : > { %729 = vmatprep.subr.bf16.mxu0 %v1819_v18 }
  0xb3   : > { %v2525_v18 = vshrl.u32 %v463_v17, 7 }
  0xb4   : > { %1111 = vmatpush1.bf16.msra.mxu1 %v1887_v45 }
  0xb5   : > { %730 = vmatpush2.bf16.msra.mxu0 %v1821_v19  ;;  %1112 = vmatprep.subr.bf16.mxu1 %v1888_v47  ;;  %v469_v19 = vsub.s32 1, %v2525_v18 }
  0xb6   : > { %731 = vmatprep.subr.bf16.mxu0 %v1822_v20  ;;  %v465_v20 = vsub.s32 0, %v2525_v18 }
  0xb8   : > { %1113 = vmatpush1.bf16.msra.mxu1 %v1890_v49  ;;  %v2536_v24 = vrot.slane %v461_v21, %v465_v20 }
  0xb9   : > { %732 = vmatpush2.bf16.msra.mxu0 %v1824_v23  ;;  %1114 = vmatprep.subr.bf16.mxu1 %v1891_v50  ;;  %v2532_v23 = vrot.slane %v461_v21, %v469_v19 }
  0xba   : > { %733 = vmatprep.subr.bf16.mxu0 %v1825_v25 }
  0xbc   : > { %1115 = vmatpush2.bf16.msra.mxu1 %v1893_v53 }
  0xbd   : > { %734 = vmatpush2.bf16.msra.mxu0 %v1827_v28  ;;  %1116 = vmatprep.subr.bf16.mxu1 %v1894_v54 }
  0xbe   : > { %735 = vmatprep.subr.bf16.mxu0 %v1828_v29 }
  0xc0   : > { %1117 = vmatpush2.bf16.msra.mxu1 %v1896_v55 }
  0xc1   : > { %736 = vmatpush2.bf16.msra.mxu0 %v1830_v32  ;;  %1118 = vmatprep.subr.bf16.mxu1 %v1897_v56 }
  0xc2   : > { %737 = vmatprep.subr.bf16.mxu0 %v1831_v33 }
  0xc4   : > { %1119 = vmatpush2.bf16.msra.mxu1 %v1899_v59 }
  0xc5   : > { %738 = vmatpush2.bf16.msra.mxu0 %v1833_v36  ;;  %1120 = vmatprep.subr.bf16.mxu1 %v1900_v60 }
  0xc6   : > { %739 = vmatprep.subr.bf16.mxu0 %v1834_v37 }
  0xc8   : > { %1121 = vmatpush2.bf16.msra.mxu1 %v1902_v61 }
  0xc9   : > { %740 = vmatpush2.bf16.msra.mxu0 %v1836_v40  ;;  %1122 = vmatprep.subr.bf16.mxu1 %v1903_v62 }
  0xca   : > { %741 = vmatprep.subr.bf16.mxu0 %v1837_v42 }
  0xcc   : > { %1123 = vmatpush2.bf16.msra.mxu1 %v1905_v1 }
  0xcd   : > { %742 = vmatpush2.bf16.msra.mxu0 %v1839_v44  ;;  %1124 = vmatprep.subr.bf16.mxu1 %v1906_v11 }
  0xce   : > { %743 = vmatprep.subr.bf16.mxu0 %v1840_v46 }
  0xd0   : > { %1125 = vmatpush2.bf16.msra.mxu1 %v1908_v12 }
  0xd1   : > { %744 = vmatpush2.bf16.msra.mxu0 %v1842_v48  ;;  %1126 = vmatprep.subr.bf16.mxu1 %v1909_v13 }
  0xd4   : > { %746 = vmatmul.mubr.bf16.vlgmr.msra.gmra.mxu0 %v1843_v51  ;;  %1127 = vmatpush2.bf16.msra.mxu1 %v1911_v14 }
  0xd5   : > { %755 = vmatprep.mubr.bf16.mxu0 %v1846_v52  ;;  %1128 = vmatprep.subr.bf16.mxu1 %v1912_v15 }
  0xd8   : > { %1129 = vmatpush2.bf16.msra.mxu1 %v1914_v16 }
  0xdc   : > { %756 = vmatmul.mubr.bf16.gmra.mxu0 %v1848_v57 }
  0xdd   : > { %765 = vmatprep.mubr.bf16.mxu0 %v1849_v58 }
  0xe4   : > { %766 = vmatmul.mubr.bf16.gmra.mxu0 %v1851_v63 }
  0xe5   : > { %775 = vmatprep.mubr.bf16.mxu0 %v1852_v0 }
  0xec   : > { %776 = vmatmul.mubr.bf16.gmra.mxu0 %v1854_v2 }
  0xed   : > { %785 = vmatprep.mubr.bf16.mxu0 %v1855_v3 }
  0xf4   : > { %786 = vmatmul.mubr.bf16.gmra.mxu0 %v1857_v4 }
  0xf5   : > { %795 = vmatprep.mubr.bf16.mxu0 %v1858_v5 }
  0xfc   : > { %796 = vmatmul.mubr.bf16.gmra.mxu0 %v1860_v6 }
  0xfd   : > { %805 = vmatprep.mubr.bf16.mxu0 %v1861_v7 }
 0x104   : > { %806 = vmatmul.mubr.bf16.gmra.mxu0 %v1863_v8 }
 0x105   : > { %815 = vmatprep.mubr.bf16.mxu0 %v1864_v9 }
 0x10c   : > { %816 = vmatmul.mubr.bf16.gmra.mxu0 %v1866_v10 }
 0x194   : > { %v747_v22 = vpop.f32.mrf.mxu0 }
 0x195   : > { %v748_v29 = vadd.f32 %v747_v22, %v2536_v24 }
 0x196   : > { %v749_v25 = vpop.f32.mrf.mxu0 }
 0x197   : > { %v750_v27 = vadd.f32 %v749_v25, %v2532_v23  ;;  %v826_v36 = vmax.f32 %v748_v29, 0.0 }
 0x198   : > { %v751_v26 = vpop.f32.mrf.mxu0 }
 0x199   : > { %v752_v28 = vadd.f32 %v751_v26, %v2536_v24  ;;  %v827_v34 = vmax.f32 %v750_v27, 0.0 }
 0x19a   : > { %v753_v30 = vpop.f32.mrf.mxu0 }
 0x19b   : > { %v754_v31 = vadd.f32 %v753_v30, %v2532_v23  ;;  %v828_v32 = vmax.f32 %v752_v28, 0.0 }
 0x19c   : > { %v757_v33 = vpop.f32.mrf.mxu0 }
 0x19d   : > { %v829_v35 = vmax.f32 %v754_v31, 0.0  ;;  %v890_v39 = vpack.c.bf16 %v828_v32, %v826_v36  ;;  %v758_v43 = vadd.f32 %v757_v33, %v2536_v24 }
 0x19e   : > { %v759_v37 = vpop.f32.mrf.mxu0 }
 0x19f   : > { %v891_v38 = vpack.c.bf16 %v829_v35, %v827_v34  ;;  %v760_v41 = vadd.f32 %v759_v37, %v2532_v23  ;;  %v830_v50 = vmax.f32 %v758_v43, 0.0 }
 0x1a0   : > { %v761_v40 = vpop.f32.mrf.mxu0 }
 0x1a1   : > { %v762_v42 = vadd.f32 %v761_v40, %v2536_v24  ;;  %1130 = vmatprep.mubr.bf16.mxu1 %v891_v38  ;;  %v831_v48 = vmax.f32 %v760_v41, 0.0 }
 0x1a2   : > { %v763_v44 = vpop.f32.mrf.mxu0  ;;  %1131 = vmatmul.mubr.bf16.vlgmr.msra.gmra.mxu1 %v890_v39 }
 0x1a3   : > { %v764_v45 = vadd.f32 %v763_v44, %v2532_v23  ;;  %v832_v46 = vmax.f32 %v762_v42, 0.0 }
 0x1a4   : > { %v767_v47 = vpop.f32.mrf.mxu0 }
 0x1a5   : > { %v833_v49 = vmax.f32 %v764_v45, 0.0  ;;  %v892_v53 = vpack.c.bf16 %v832_v46, %v830_v50  ;;  %v768_v57 = vadd.f32 %v767_v47, %v2536_v24 }
 0x1a6   : > { %v769_v51 = vpop.f32.mrf.mxu0 }
 0x1a7   : > { %v893_v52 = vpack.c.bf16 %v833_v49, %v831_v48  ;;  %v770_v55 = vadd.f32 %v769_v51, %v2532_v23  ;;  %v834_v0 = vmax.f32 %v768_v57, 0.0 }
 0x1a8   : > { %v771_v54 = vpop.f32.mrf.mxu0 }
 0x1a9   : > { %v772_v56 = vadd.f32 %v771_v54, %v2536_v24  ;;  %1140 = vmatprep.mubr.bf16.mxu1 %v893_v52  ;;  %v835_v62 = vmax.f32 %v770_v55, 0.0 }
 0x1aa   : > { %v773_v58 = vpop.f32.mrf.mxu0  ;;  %1141 = vmatmul.mubr.bf16.gmra.mxu1 %v892_v53 }
 0x1ab   : > { %v774_v59 = vadd.f32 %v773_v58, %v2532_v23  ;;  %v836_v60 = vmax.f32 %v772_v56, 0.0 }
 0x1ac   : > { %v777_v61 = vpop.f32.mrf.mxu0 }
 0x1ad   : > { %v837_v63 = vmax.f32 %v774_v59, 0.0  ;;  %v894_v3 = vpack.c.bf16 %v836_v60, %v834_v0  ;;  %v778_v7 = vadd.f32 %v777_v61, %v2536_v24 }
 0x1ae   : > { %v779_v1 = vpop.f32.mrf.mxu0 }
 0x1af   : > { %v895_v2 = vpack.c.bf16 %v837_v63, %v835_v62  ;;  %v780_v5 = vadd.f32 %v779_v1, %v2532_v23  ;;  %v838_v14 = vmax.f32 %v778_v7, 0.0 }
 0x1b0   : > { %v781_v4 = vpop.f32.mrf.mxu0 }
 0x1b1   : > { %v782_v6 = vadd.f32 %v781_v4, %v2536_v24  ;;  %1150 = vmatprep.mubr.bf16.mxu1 %v895_v2  ;;  %v839_v12 = vmax.f32 %v780_v5, 0.0 }
 0x1b2   : > { %v783_v8 = vpop.f32.mrf.mxu0  ;;  %1151 = vmatmul.mubr.bf16.gmra.mxu1 %v894_v3 }
 0x1b3   : > { %v784_v9 = vadd.f32 %v783_v8, %v2532_v23  ;;  %v840_v10 = vmax.f32 %v782_v6, 0.0 }
 0x1b4   : > { %v787_v11 = vpop.f32.mrf.mxu0 }
 0x1b5   : > { %v841_v13 = vmax.f32 %v784_v9, 0.0  ;;  %v896_v17 = vpack.c.bf16 %v840_v10, %v838_v14  ;;  %v788_v26 = vadd.f32 %v787_v11, %v2536_v24 }
 0x1b6   : > { %v789_v15 = vpop.f32.mrf.mxu0 }
 0x1b7   : > { %v897_v16 = vpack.c.bf16 %v841_v13, %v839_v12  ;;  %v790_v22 = vadd.f32 %v789_v15, %v2532_v23  ;;  %v842_v33 = vmax.f32 %v788_v26, 0.0  ;;  %v858_v13 = vld [vmem:[#allocation2 + $0xb0] sm:$0xff]  ;;  %v859_v15 = vld [vmem:[#allocation2] sm:$0xff] }
 0x1b8   : > { %v791_v21 = vpop.f32.mrf.mxu0 }
 0x1b9   : > { %v792_v25 = vadd.f32 %v791_v21, %v2536_v24  ;;  %1160 = vmatprep.mubr.bf16.mxu1 %v897_v16  ;;  %v843_v31 = vmax.f32 %v790_v22, 0.0  ;;  %v860_v21 = vld [vmem:[#allocation2 + $0xd8] sm:$0xff] }
 0x1ba   : > { %v793_v27 = vpop.f32.mrf.mxu0  ;;  %1161 = vmatmul.mubr.bf16.gmra.mxu1 %v896_v17 }
 0x1bb   : > { %v794_v28 = vadd.f32 %v793_v27, %v2532_v23  ;;  %v844_v29 = vmax.f32 %v792_v25, 0.0  ;;  %v861_v25 = vld [vmem:[#allocation2 + $0x18] sm:$0xff]  ;;  %v862_v27 = vld [vmem:[#allocation2 + $0x50] sm:$0xff] }
 0x1bc   : > { %v797_v30 = vpop.f32.mrf.mxu0 }
 0x1bd   : > { %v845_v32 = vmax.f32 %v794_v28, 0.0  ;;  %v898_v36 = vpack.c.bf16 %v844_v29, %v842_v33  ;;  %v798_v40 = vadd.f32 %v797_v30, %v2536_v24  ;;  %v863_v30 = vld [vmem:[#allocation2 + $0x68] sm:$0xff]  ;;  %v864_v33 = vld [vmem:[#allocation2 + $0x30] sm:$0xff] }
 0x1be   : > { %v799_v34 = vpop.f32.mrf.mxu0 }
 0x1bf   : > { %v899_v35 = vpack.c.bf16 %v845_v32, %v843_v31  ;;  %v800_v38 = vadd.f32 %v799_v34, %v2532_v23  ;;  %v846_v47 = vmax.f32 %v798_v40, 0.0 }
 0x1c0   : > { %v801_v37 = vpop.f32.mrf.mxu0 }
 0x1c1   : > { %v802_v39 = vadd.f32 %v801_v37, %v2536_v24  ;;  %1170 = vmatprep.mubr.bf16.mxu1 %v899_v35  ;;  %v847_v45 = vmax.f32 %v800_v38, 0.0 }
 0x1c2   : > { %v803_v41 = vpop.f32.mrf.mxu0  ;;  %1171 = vmatmul.mubr.bf16.gmra.mxu1 %v898_v36  ;;  %v865_v36 = vld [vmem:[#allocation2 + $0x48] sm:$0xff] }
 0x1c3   : > { %v804_v42 = vadd.f32 %v803_v41, %v2532_v23  ;;  %v848_v43 = vmax.f32 %v802_v39, 0.0  ;;  %v866_v39 = vld [vmem:[#allocation2 + $0x80] sm:$0xff] }
 0x1c4   : > { %v807_v44 = vpop.f32.mrf.mxu0 }
 0x1c5   : > { %v849_v46 = vmax.f32 %v804_v42, 0.0  ;;  %v900_v50 = vpack.c.bf16 %v848_v43, %v846_v47  ;;  %v808_v54 = vadd.f32 %v807_v44, %v2536_v24  ;;  %v867_v42 = vld [vmem:[#allocation2 + $0x88] sm:$0xff] }
 0x1c6   : > { %v809_v48 = vpop.f32.mrf.mxu0 }
 0x1c7   : > { %v901_v49 = vpack.c.bf16 %v849_v46, %v847_v45  ;;  %v810_v52 = vadd.f32 %v809_v48, %v2532_v23  ;;  %v850_v61 = vmax.f32 %v808_v54, 0.0  ;;  %v868_v45 = vld [vmem:[#allocation2 + $0xe8] sm:$0xff]  ;;  %v869_v48 = vld [vmem:[#allocation2 + $0xb8] sm:$0xff]  ;;  %v871_v54 = vld [vmem:[#allocation2 + $0xf0] sm:$0xff] }
 0x1c8   : > { %v811_v51 = vpop.f32.mrf.mxu0 }
 0x1c9   : > { %v812_v53 = vadd.f32 %v811_v51, %v2536_v24  ;;  %1180 = vmatprep.mubr.bf16.mxu1 %v901_v49  ;;  %v851_v59 = vmax.f32 %v810_v52, 0.0  ;;  %v870_v51 = vld [vmem:[#allocation2 + $0x60] sm:$0xff] }
 0x1ca   : > { %v813_v55 = vpop.f32.mrf.mxu0  ;;  %1181 = vmatmul.mubr.bf16.gmra.mxu1 %v900_v50 }
 0x1cb   : > { %v814_v56 = vadd.f32 %v813_v55, %v2532_v23  ;;  %v852_v57 = vmax.f32 %v812_v53, 0.0 }
 0x1cc   : > { %v817_v58 = vpop.f32.mrf.mxu0 }
 0x1cd   : > { %v853_v60 = vmax.f32 %v814_v56, 0.0  ;;  %v902_v0 = vpack.c.bf16 %v852_v57, %v850_v61  ;;  %v818_v4 = vadd.f32 %v817_v58, %v2536_v24  ;;  %v872_v57 = vld [vmem:[#allocation2 + $0x8] sm:$0xff] }
 0x1ce   : > { %v819_v62 = vpop.f32.mrf.mxu0 }
 0x1cf   : > { %v903_v63 = vpack.c.bf16 %v853_v60, %v851_v59  ;;  %v820_v2 = vadd.f32 %v819_v62, %v2532_v23  ;;  %v854_v10 = vmax.f32 %v818_v4, 0.0  ;;  %v873_v60 = vld [vmem:[#allocation2 + $0x78] sm:$0xff] }
 0x1d0   : > { %v821_v1 = vpop.f32.mrf.mxu0 }
 0x1d1   : > { %v822_v3 = vadd.f32 %v821_v1, %v2536_v24  ;;  %1190 = vmatprep.mubr.bf16.mxu1 %v903_v63  ;;  %v855_v8 = vmax.f32 %v820_v2, 0.0  ;;  %v874_v63 = vld [vmem:[#allocation2 + $0x38] sm:$0xff] }
 0x1d2   : > { %v823_v5 = vpop.f32.mrf.mxu0  ;;  %1191 = vmatmul.mubr.bf16.gmra.mxu1 %v902_v0  ;;  %v875_v2 = vld [vmem:[#allocation2 + $0x58] sm:$0xff] }
 0x1d3   : > { %v824_v6 = vadd.f32 %v823_v5, %v2532_v23  ;;  %v856_v7 = vmax.f32 %v822_v3, 0.0  ;;  %v876_v5 = vld [vmem:[#allocation2 + $0x40] sm:$0xff] }
 0x1d5   : > { %v857_v9 = vmax.f32 %v824_v6, 0.0  ;;  %v904_v12 = vpack.c.bf16 %v856_v7, %v854_v10 }
 0x1d7   : > { %v905_v11 = vpack.c.bf16 %v857_v9, %v855_v8  ;;  %v877_v8 = vld [vmem:[#allocation2 + $0xc8] sm:$0xff] }
 0x1d9   : > { %1200 = vmatprep.mubr.bf16.mxu1 %v905_v11  ;;  %v878_v11 = vld [vmem:[#allocation2 + $0xe0] sm:$0xff] }
 0x1da   : > { %1201 = vmatmul.mubr.bf16.gmra.mxu1 %v904_v12 }
 0x262   : > { %v1132_v14 = vpop.f32.mrf.mxu1 }
 0x263   : > { %v1211_v16 = vadd.f32 %v1132_v14, %v858_v13  ;;  %v879_v14 = vld [vmem:[#allocation2 + $0x90] sm:$0xff] }
 0x264   : > { %v1134_v17 = vpop.f32.mrf.mxu1 }
 0x265   : > { %1243 = vst [vmem:[#allocation2 + $0xb0] sm:$0xff] %v1211_v16  ;;  %v1212_v24 = vadd.f32 %v1134_v17, %v859_v15  ;;  %v880_v17 = vld [vmem:[#allocation2 + $0x70] sm:$0xff] }
 0x266   : > { %v1136_v22 = vpop.f32.mrf.mxu1 }
 0x267   : > { %1244 = vst [vmem:[#allocation2] sm:$0xff] %v1212_v24  ;;  %v1213_v23 = vadd.f32 %v1136_v22, %v860_v21  ;;  %v881_v22 = vld [vmem:[#allocation2 + $0xc0] sm:$0xff] }
 0x268   : > { %v1138_v26 = vpop.f32.mrf.mxu1 }
 0x269   : > { %1245 = vst [vmem:[#allocation2 + $0xd8] sm:$0xff] %v1213_v23  ;;  %v1214_v28 = vadd.f32 %v1138_v26, %v861_v25  ;;  %v882_v26 = vld [vmem:[#allocation2 + $0xa8] sm:$0xff] }
 0x26a   : > { %v1142_v29 = vpop.f32.mrf.mxu1 }
 0x26b   : > { %1246 = vst [vmem:[#allocation2 + $0x18] sm:$0xff] %v1214_v28  ;;  %v1215_v31 = vadd.f32 %v1142_v29, %v862_v27  ;;  %v883_v29 = vld [vmem:[#allocation2 + $0xd0] sm:$0xff] }
 0x26c   : > { %v1144_v32 = vpop.f32.mrf.mxu1 }
 0x26d   : > { %1247 = vst [vmem:[#allocation2 + $0x50] sm:$0xff] %v1215_v31  ;;  %v1216_v34 = vadd.f32 %v1144_v32, %v863_v30  ;;  %v884_v32 = vld [vmem:[#allocation2 + $0x10] sm:$0xff] }
 0x26e   : > { %v1146_v35 = vpop.f32.mrf.mxu1 }
 0x26f   : > { %1248 = vst [vmem:[#allocation2 + $0x68] sm:$0xff] %v1216_v34  ;;  %v1217_v37 = vadd.f32 %v1146_v35, %v864_v33  ;;  %v885_v35 = vld [vmem:[#allocation2 + $0x28] sm:$0xff] }
 0x270   : > { %v1148_v38 = vpop.f32.mrf.mxu1 }
 0x271   : > { %1249 = vst [vmem:[#allocation2 + $0x30] sm:$0xff] %v1217_v37  ;;  %v1218_v40 = vadd.f32 %v1148_v38, %v865_v36  ;;  %v886_v38 = vld [vmem:[#allocation2 + $0xa0] sm:$0xff] }
 0x272   : > { %v1152_v41 = vpop.f32.mrf.mxu1 }
 0x273   : > { %1250 = vst [vmem:[#allocation2 + $0x48] sm:$0xff] %v1218_v40  ;;  %v1219_v43 = vadd.f32 %v1152_v41, %v866_v39  ;;  %v887_v41 = vld [vmem:[#allocation2 + $0xf8] sm:$0xff] }
 0x274   : > { %v1154_v44 = vpop.f32.mrf.mxu1 }
 0x275   : > { %1251 = vst [vmem:[#allocation2 + $0x80] sm:$0xff] %v1219_v43  ;;  %v1220_v46 = vadd.f32 %v1154_v44, %v867_v42  ;;  %v888_v44 = vld [vmem:[#allocation2 + $0x20] sm:$0xff] }
 0x276   : > { %v1156_v47 = vpop.f32.mrf.mxu1 }
 0x277   : > { %1252 = vst [vmem:[#allocation2 + $0x88] sm:$0xff] %v1220_v46  ;;  %v1221_v49 = vadd.f32 %v1156_v47, %v868_v45  ;;  %v889_v47 = vld [vmem:[#allocation2 + $0x98] sm:$0xff] }
 0x278   : > { %v1158_v50 = vpop.f32.mrf.mxu1 }
 0x279   : > { %1253 = vst [vmem:[#allocation2 + $0xe8] sm:$0xff] %v1221_v49  ;;  %v1222_v52 = vadd.f32 %v1158_v50, %v869_v48 }
 0x27a   : > { %v1162_v53 = vpop.f32.mrf.mxu1 }
 0x27b   : > { %1254 = vst [vmem:[#allocation2 + $0xb8] sm:$0xff] %v1222_v52  ;;  %v1223_v55 = vadd.f32 %v1162_v53, %v870_v51 }
 0x27c   : > { %v1164_v56 = vpop.f32.mrf.mxu1 }
 0x27d   : > { %1255 = vst [vmem:[#allocation2 + $0x60] sm:$0xff] %v1223_v55  ;;  %v1224_v58 = vadd.f32 %v1164_v56, %v871_v54 }
 0x27e   : > { %v1166_v59 = vpop.f32.mrf.mxu1 }
 0x27f   : > { %1256 = vst [vmem:[#allocation2 + $0xf0] sm:$0xff] %v1224_v58  ;;  %v1225_v61 = vadd.f32 %v1166_v59, %v872_v57 }
 0x280   : > { %v1168_v62 = vpop.f32.mrf.mxu1 }
 0x281   : > { %1257 = vst [vmem:[#allocation2 + $0x8] sm:$0xff] %v1225_v61  ;;  %v1226_v0 = vadd.f32 %v1168_v62, %v873_v60 }
 0x282   : > { %v1172_v1 = vpop.f32.mrf.mxu1 }
 0x283   : > { %1258 = vst [vmem:[#allocation2 + $0x78] sm:$0xff] %v1226_v0  ;;  %v1227_v3 = vadd.f32 %v1172_v1, %v874_v63 }
 0x284   : > { %v1174_v4 = vpop.f32.mrf.mxu1 }
 0x285   : > { %1259 = vst [vmem:[#allocation2 + $0x38] sm:$0xff] %v1227_v3  ;;  %v1228_v6 = vadd.f32 %v1174_v4, %v875_v2 }
 0x286   : > { %v1176_v7 = vpop.f32.mrf.mxu1 }
 0x287   : > { %1260 = vst [vmem:[#allocation2 + $0x58] sm:$0xff] %v1228_v6  ;;  %v1229_v9 = vadd.f32 %v1176_v7, %v876_v5 }
 0x288   : > { %v1178_v10 = vpop.f32.mrf.mxu1 }
 0x289   : > { %1261 = vst [vmem:[#allocation2 + $0x40] sm:$0xff] %v1229_v9  ;;  %v1230_v12 = vadd.f32 %v1178_v10, %v877_v8 }
 0x28a   : > { %v1182_v13 = vpop.f32.mrf.mxu1 }
 0x28b   : > { %1262 = vst [vmem:[#allocation2 + $0xc8] sm:$0xff] %v1230_v12  ;;  %v1231_v15 = vadd.f32 %v1182_v13, %v878_v11 }
 0x28c   : > { %v1184_v16 = vpop.f32.mrf.mxu1 }
 0x28d   : > { %1263 = vst [vmem:[#allocation2 + $0xe0] sm:$0xff] %v1231_v15  ;;  %v1232_v21 = vadd.f32 %v1184_v16, %v879_v14 }
 0x28e   : > { %v1186_v24 = vpop.f32.mrf.mxu1 }
 0x28f   : > { %1264 = vst [vmem:[#allocation2 + $0x90] sm:$0xff] %v1232_v21  ;;  %v1233_v25 = vadd.f32 %v1186_v24, %v880_v17 }
 0x290   : > { %v1188_v23 = vpop.f32.mrf.mxu1 }
 0x291   : > { %1265 = vst [vmem:[#allocation2 + $0x70] sm:$0xff] %v1233_v25  ;;  %v1234_v27 = vadd.f32 %v1188_v23, %v881_v22 }
 0x292   : > { %v1192_v28 = vpop.f32.mrf.mxu1 }
 0x293   : > { %1266 = vst [vmem:[#allocation2 + $0xc0] sm:$0xff] %v1234_v27  ;;  %v1235_v30 = vadd.f32 %v1192_v28, %v882_v26 }
 0x294   : > { %v1194_v31 = vpop.f32.mrf.mxu1 }
 0x295   : > { %1267 = vst [vmem:[#allocation2 + $0xa8] sm:$0xff] %v1235_v30  ;;  %v1236_v33 = vadd.f32 %v1194_v31, %v883_v29 }
 0x296   : > { %v1196_v34 = vpop.f32.mrf.mxu1 }
 0x297   : > { %1268 = vst [vmem:[#allocation2 + $0xd0] sm:$0xff] %v1236_v33  ;;  %v1237_v36 = vadd.f32 %v1196_v34, %v884_v32 }
 0x298   : > { %v1198_v37 = vpop.f32.mrf.mxu1 }
 0x299   : > { %1269 = vst [vmem:[#allocation2 + $0x10] sm:$0xff] %v1237_v36  ;;  %v1238_v39 = vadd.f32 %v1198_v37, %v885_v35 }
 0x29a   : > { %v1202_v40 = vpop.f32.mrf.mxu1 }
 0x29b   : > { %1270 = vst [vmem:[#allocation2 + $0x28] sm:$0xff] %v1238_v39  ;;  %v1239_v42 = vadd.f32 %v1202_v40, %v886_v38 }
 0x29c   : > { %v1204_v43 = vpop.f32.mrf.mxu1 }
 0x29d   : > { %1271 = vst [vmem:[#allocation2 + $0xa0] sm:$0xff] %v1239_v42  ;;  %v1240_v45 = vadd.f32 %v1204_v43, %v887_v41 }
 0x29e   : > { %v1206_v46 = vpop.f32.mrf.mxu1 }
 0x29f   : > { %1272 = vst [vmem:[#allocation2 + $0xf8] sm:$0xff] %v1240_v45  ;;  %v1241_v48 = vadd.f32 %v1206_v46, %v888_v44  ;;  %1278 = sbr.rel (%p1657_p8) target bundleno = 697 (0x2b9), region = 64 }
 0x2a0   : > { %v1208_v49 = vpop.f32.mrf.mxu1 }
 0x2a1   : > { %1273 = vst [vmem:[#allocation2 + $0x20] sm:$0xff] %v1241_v48  ;;  %v1242_v50 = vadd.f32 %v1208_v49, %v889_v47 }
 0x2a3   : > { %1274 = vst [vmem:[#allocation2 + $0x98] sm:$0xff] %v1242_v50 }
 0x2a4   : > { %v1279_v51 = vld [vmem:[#allocation2 + $0xb0] sm:$0xff]  ;;  %v1311_v52 = vld [vmem:[%s2769_s1] sm:$0x3]  ;;  %v1281_v56 = vld [vmem:[#allocation2 + $0xd8] sm:$0xff] }
 0x2a5   : > { %v1280_v53 = vld [vmem:[#allocation2] sm:$0xff]  ;;  %v2576_v54 = vrot.slane %v1311_v52, %v465_v20  ;;  %v2580_v55 = vrot.slane %v1311_v52, %v469_v19  ;;  %v1282_v57 = vld [vmem:[#allocation2 + $0x18] sm:$0xff]  ;;  %v1283_v58 = vld [vmem:[#allocation2 + $0x50] sm:$0xff] }
 0x2a6   : > { %v1284_v59 = vld [vmem:[#allocation2 + $0x68] sm:$0xff]  ;;  %v1285_v60 = vld [vmem:[#allocation2 + $0x30] sm:$0xff]  ;;  %v1287_v19 = vld [vmem:[#allocation2 + $0x80] sm:$0xff] }
 0x2a7   : > { %v1286_v61 = vld [vmem:[#allocation2 + $0x48] sm:$0xff]  ;;  %v1323_v62 = vadd.f32 %v2576_v54, %v1279_v51  ;;  %v1324_v63 = vadd.f32 %v2580_v55, %v1280_v53  ;;  %v1325_v20 = vadd.f32 %v2576_v54, %v1281_v56  ;;  %v1326_v18 = vadd.f32 %v2580_v55, %v1282_v57  ;;  %v1290_v6 = vld [vmem:[#allocation2 + $0xb8] sm:$0xff]  ;;  %v1291_v7 = vld [vmem:[#allocation2 + $0x60] sm:$0xff] }
 0x2a8   : > { %v1288_v0 = vld [vmem:[#allocation2 + $0x88] sm:$0xff]  ;;  %v1327_v2 = vadd.f32 %v2576_v54, %v1283_v58  ;;  %v1328_v3 = vadd.f32 %v2580_v55, %v1284_v59  ;;  %v1329_v4 = vadd.f32 %v2576_v54, %v1285_v60  ;;  %v1330_v5 = vadd.f32 %v2580_v55, %v1286_v61  ;;  %v1292_v8 = vld [vmem:[#allocation2 + $0xf0] sm:$0xff]  ;;  %v1294_v14 = vld [vmem:[#allocation2 + $0x78] sm:$0xff] }
 0x2a9   : > { %v1289_v1 = vld [vmem:[#allocation2 + $0xe8] sm:$0xff]  ;;  %1355 = vst [vmem:[%s2442_s9] sm:$0xff] %v1323_v62  ;;  %1356 = vst [vmem:[%s2442_s9 + $0x8] sm:$0xff] %v1324_v63  ;;  %v1331_v9 = vadd.f32 %v2576_v54, %v1287_v19  ;;  %v1332_v10 = vadd.f32 %v2580_v55, %v1288_v0  ;;  %v1334_v12 = vadd.f32 %v2580_v55, %v1290_v6  ;;  %v1295_v15 = vld [vmem:[#allocation2 + $0x38] sm:$0xff] }
 0x2aa   : > { %1357 = vst [vmem:[%s2442_s9 + $0x10] sm:$0xff] %v1325_v20  ;;  %1358 = vst [vmem:[%s2442_s9 + $0x18] sm:$0xff] %v1326_v18  ;;  %v1333_v11 = vadd.f32 %v2576_v54, %v1289_v1  ;;  %v1293_v13 = vld [vmem:[#allocation2 + $0x8] sm:$0xff]  ;;  %v1335_v16 = vadd.f32 %v2576_v54, %v1291_v7  ;;  %v1336_v17 = vadd.f32 %v2580_v55, %v1292_v8  ;;  %v1296_v22 = vld [vmem:[#allocation2 + $0x58] sm:$0xff] }
 0x2ab   : > { %1359 = vst [vmem:[%s2442_s9 + $0x20] sm:$0xff] %v1327_v2  ;;  %1360 = vst [vmem:[%s2442_s9 + $0x28] sm:$0xff] %v1328_v3  ;;  %v1337_v21 = vadd.f32 %v2576_v54, %v1293_v13  ;;  %v1338_v24 = vadd.f32 %v2580_v55, %v1294_v14  ;;  %v1297_v25 = vld [vmem:[#allocation2 + $0x40] sm:$0xff]  ;;  %v1298_v23 = vld [vmem:[#allocation2 + $0xc8] sm:$0xff]  ;;  %v1339_v26 = vadd.f32 %v2576_v54, %v1295_v15 }
 0x2ac   : > { %1361 = vst [vmem:[%s2442_s9 + $0x30] sm:$0xff] %v1329_v4  ;;  %1362 = vst [vmem:[%s2442_s9 + $0x38] sm:$0xff] %v1330_v5  ;;  %v1340_v27 = vadd.f32 %v2580_v55, %v1296_v22  ;;  %v1341_v28 = vadd.f32 %v2576_v54, %v1297_v25  ;;  %v1342_v29 = vadd.f32 %v2580_v55, %v1298_v23  ;;  %v1299_v30 = vld [vmem:[#allocation2 + $0xe0] sm:$0xff]  ;;  %v1300_v31 = vld [vmem:[#allocation2 + $0x90] sm:$0xff] }
 0x2ad   : > { %1363 = vst [vmem:[%s2442_s9 + $0x40] sm:$0xff] %v1331_v9  ;;  %1364 = vst [vmem:[%s2442_s9 + $0x48] sm:$0xff] %v1332_v10  ;;  %v1301_v32 = vld [vmem:[#allocation2 + $0x70] sm:$0xff]  ;;  %v1343_v33 = vadd.f32 %v2576_v54, %v1299_v30  ;;  %v1344_v34 = vadd.f32 %v2580_v55, %v1300_v31  ;;  %v1302_v36 = vld [vmem:[#allocation2 + $0xc0] sm:$0xff] }
 0x2ae   : > { %1365 = vst [vmem:[%s2442_s9 + $0x50] sm:$0xff] %v1333_v11  ;;  %1366 = vst [vmem:[%s2442_s9 + $0x58] sm:$0xff] %v1334_v12  ;;  %v1345_v35 = vadd.f32 %v2576_v54, %v1301_v32  ;;  %v1303_v37 = vld [vmem:[#allocation2 + $0xa8] sm:$0xff]  ;;  %v1304_v38 = vld [vmem:[#allocation2 + $0xd0] sm:$0xff]  ;;  %v1346_v39 = vadd.f32 %v2580_v55, %v1302_v36 }
 0x2af   : > { %1367 = vst [vmem:[%s2442_s9 + $0x60] sm:$0xff] %v1335_v16  ;;  %1368 = vst [vmem:[%s2442_s9 + $0x68] sm:$0xff] %v1336_v17  ;;  %v1347_v40 = vadd.f32 %v2576_v54, %v1303_v37  ;;  %v1348_v41 = vadd.f32 %v2580_v55, %v1304_v38  ;;  %v1305_v42 = vld [vmem:[#allocation2 + $0x10] sm:$0xff]  ;;  %v1306_v43 = vld [vmem:[#allocation2 + $0x28] sm:$0xff] }
 0x2b0   : > { %1369 = vst [vmem:[%s2442_s9 + $0x70] sm:$0xff] %v1337_v21  ;;  %1370 = vst [vmem:[%s2442_s9 + $0x78] sm:$0xff] %v1338_v24  ;;  %v1307_v44 = vld [vmem:[#allocation2 + $0xa0] sm:$0xff]  ;;  %v1349_v45 = vadd.f32 %v2576_v54, %v1305_v42  ;;  %v1350_v46 = vadd.f32 %v2580_v55, %v1306_v43  ;;  %v1308_v48 = vld [vmem:[#allocation2 + $0xf8] sm:$0xff] }
 0x2b1   : > { %1371 = vst [vmem:[%s2442_s9 + $0x80] sm:$0xff] %v1339_v26  ;;  %1372 = vst [vmem:[%s2442_s9 + $0x88] sm:$0xff] %v1340_v27  ;;  %v1351_v47 = vadd.f32 %v2576_v54, %v1307_v44  ;;  %v1309_v49 = vld [vmem:[#allocation2 + $0x20] sm:$0xff]  ;;  %v1310_v50 = vld [vmem:[#allocation2 + $0x98] sm:$0xff]  ;;  %v1352_v51 = vadd.f32 %v2580_v55, %v1308_v48 }
 0x2b2   : > { %1373 = vst [vmem:[%s2442_s9 + $0x90] sm:$0xff] %v1341_v28  ;;  %1374 = vst [vmem:[%s2442_s9 + $0x98] sm:$0xff] %v1342_v29  ;;  %v1353_v52 = vadd.f32 %v2576_v54, %v1309_v49  ;;  %v1354_v53 = vadd.f32 %v2580_v55, %v1310_v50 }
 0x2b3   : > { %1375 = vst [vmem:[%s2442_s9 + $0xa0] sm:$0xff] %v1343_v33  ;;  %1376 = vst [vmem:[%s2442_s9 + $0xa8] sm:$0xff] %v1344_v34 }
 0x2b4   : > { %1377 = vst [vmem:[%s2442_s9 + $0xb0] sm:$0xff] %v1345_v35  ;;  %1378 = vst [vmem:[%s2442_s9 + $0xb8] sm:$0xff] %v1346_v39 }
 0x2b5   : > { %1379 = vst [vmem:[%s2442_s9 + $0xc0] sm:$0xff] %v1347_v40  ;;  %1380 = vst [vmem:[%s2442_s9 + $0xc8] sm:$0xff] %v1348_v41 }
 0x2b6   : > { %1381 = vst [vmem:[%s2442_s9 + $0xd0] sm:$0xff] %v1349_v45  ;;  %1382 = vst [vmem:[%s2442_s9 + $0xd8] sm:$0xff] %v1350_v46 }
 0x2b7   : > { %1383 = vst [vmem:[%s2442_s9 + $0xe0] sm:$0xff] %v1351_v47  ;;  %1384 = vst [vmem:[%s2442_s9 + $0xe8] sm:$0xff] %v1352_v51 }
 0x2b8   : > { %1385 = vst [vmem:[%s2442_s9 + $0xf0] sm:$0xff] %v1353_v52  ;;  %1386 = vst [vmem:[%s2442_s9 + $0xf8] sm:$0xff] %v1354_v53 }
 0x2b9 PF: > { %s2770_s24 = sld [smem:[#allocation19_spill]]  ;;  %s1402_s0 = sshll.u32 %s2442_s9, 4  ;;  %s2653_s0 = int_to_ptr.vmem [resolvable:$true] %s1402_s0 }
 0x2ba   : > { %s2771_s8 = sld [smem:[#allocation30_spill]]  ;;  %s1388_s15 = scalar_lea.sflag [#allocation5], %s2415_s6 }
 0x2bb   : > { %s2027_s20 = scalar_lea.vmem %s2653_s0, 4096  ;;  %s2165_s11 = smov [#allocation11]  }
 0x2bc   : > { %p2028_p1 = scmp.ne.s32.totalorder %s2653_s0, %s2027_s20  ;;  %s2031_s14 = sshll.u32 %s2165_s11, 4  ;;  %s2032_s14 = int_to_ptr.vmem [resolvable:$false] %s2031_s14 }
 0x2bd   : > { %s2033_s16 = scalar_lea.vmem %s2032_s14, 8192  ;;  %p2034_p2 = scmp.lt.s32.totalorder %s2653_s0, %s2032_s14 }
 0x2be   : > { %p2029_p0 = pnand %p2028_p1, %p2356_p13  ;;  %p2035_p3 = scmp.lt.s32.totalorder %s2033_s16, %s2027_s20 }
 0x2bf   : > { %s1671_s7 = sshll.u32 %s2770_s24, 12 }
 0x2c0   : > { %s2650_s27 = scalar_lea.hbm %s2771_s8, %s1671_s7  ;;  %p2030_p6 = pneg %p2029_p0 }
 0x2c1   : > { %p2036_p4 = por %p2035_p3, %p2034_p2 }
 0x2c3   : > { %p2037_p10 = pnand %p2036_p4, %p2030_p6 }
 0x2c5   : > { %2040 = shalt.err (!%p2037_p10)
}
 0x2c6   : > { %s2041_s12 = scalar_lea.hbm %s2650_s27, 4096  ;;  %s2045_s4 = scalar_lea.hbm %s2771_s8, 8192 }
 0x2c7   : > { %p2042_p11 = scmp.ne.s32.totalorder %s2650_s27, %s2041_s12  ;;  %p2046_p7 = scmp.lt.s32.totalorder %s2650_s27, %s2771_s8 }
 0x2c8   : > { %p2047_p5 = scmp.lt.s32.totalorder %s2045_s4, %s2041_s12 }
 0x2c9   : > { %p2043_p12 = pnand %p2042_p11, %p2356_p13 }
 0x2ca   : > { %p2048_p8 = por %p2047_p5, %p2046_p7 }
 0x2cb   : > { %p2044_p9 = pneg %p2043_p12 }
 0x2cd   : > { %p2049_p1 = pnand %p2048_p8, %p2044_p9 }
 0x2cf   : > { %2052 = shalt.err (!%p2049_p1)
}
 0x2d0   : > { %s2166_s23 = smov 256   ;;  %s2167_s17 = smov 16  }
 0x2d1   : > { %1680 = dma.vmem_to_hbm [thread:$0]  (%p2356_p13), %s2653_s0, 4096, %s2650_s27, %s1388_s15, %s2166_s23, %s2166_s23, %s2167_s17  }
 0x2d2 PF: > { %s2772_s9 = sld [smem:[#allocation21_spill]] }
 0x2d3   : > { %s2773_s5 = sld [smem:[#allocation17_spill]] }
 0x2d4   : > { %s2774_s18 = sld [smem:[#allocation26_spill]] }
 0x2d8   : > { %p1700_p0 = scmp.ge.s32.totalorder %s2772_s9, 2 }
 0x2d9   : > { %s1417_s1 = sand.u32 1, %s2773_s5  }
 0x2da   : > { %p2775_p6 = scmp.ne.s32.totalorder %s2774_s18, 0  ;;  %s1418_s24 = scalar_lea.sflag [#allocation5], %s1417_s1 }
 0x2dc   : > { %p1696_p2 = pnand %p1700_p0, %p2775_p6 }
 0x2de   : > { %p1697_p3 = pneg %p1696_p2 }
 0x2e0   : > { %2110 = dma.done.wait (%p1697_p3), %s1418_s24, 4096  }
 0x2e1   : > { %2112 = vsyncadd (%p1697_p3), %s1418_s24, 4294963200  ;;  %s27_s28 = sadd.s32 1, %s2772_s9   ;;  %s2776_s7 = sld [smem:[#allocation16_spill]] }
 0x2e2   : > { %p24_p4 = scmp.ge.s32.totalorder %s27_s28, 6   ;;  %s2777_s20 = sld [smem:[#allocation24_spill]] }
 0x2e3   : > { %s2778_s29 = sld [smem:[#allocation18_spill]]  ;;  %s2783_s18 = smov %s2119_s19 }
 0x2e4   : > { %s2779_s23 = sld [smem:[#allocation25_spill]]  ;;  %s2785_s21 = smov %s2131_s22 }
 0x2e5   : > { %s2780_s25 = sld [smem:[#allocation20_spill]]  ;;  %s2787_s24 = smov %s2147_s26 }
 0x2e6   : > { %s2781_s6 = sld [smem:[#allocation22_spill]] }
 0x2e7   : > { %s2782_s27 = sld [smem:[#allocation23_spill]]  ;;  %s2784_s19 = smov %s2776_s7 }
 0x2e8   :  { %26 = sbr.rel (!%p24_p4) target bundleno = 18 (0x12), region = 130 }
 0x2e9   : > { %s2786_s22 = smov %s2778_s29 }
 0x2ec   : > { %s2788_s26 = smov %s2781_s6 }
 0x2ed   :  { %1423 = vsyncpa [#allocation4], 1 }
 0x2ee   :  { %1425 = vsyncpa [#allocation4 + $0x1], 1 }
 0x2ef   :  { %1426 = vsyncpa [#allocation7], 1 }
 0x2f0   :  { %1428 = vsyncpa [#allocation7 + $0x1], 1 }
 0x2f1   :  { %1429 = vsyncpa [#allocation10], 1 }
 0x2f2   :  { %1431 = vsyncpa [#allocation10 + $0x1], 1 }
 0x2f3   :  { %1432 = vsyncpa [#allocation5], 1 }
 0x2f4   :  { %1434 = vsyncpa [#allocation5 + $0x1], 1 }

</bundles_post_ra>
